<compile_context>
chip_gen: v7x
topology: tpu7x:2x2x1
jax: 0.10.0
libtpu: 0.0.40
codegen_flags: <defaults>
</compile_context>

<pallas_src>
import functools

import jax
import jax.numpy as jnp
from jax.experimental import pallas as pl
from jax.experimental.pallas import tpu as pltpu


def _vmem_limit_bytes():
    """~0.8x physical VMEM (v5e/v6e: 128 MiB, v7x: 64 MiB); conservative fallback."""
    phys = 64 * 1024 * 1024
    try:
        info = pltpu.get_tpu_info()
        cap = getattr(info, "vmem_capacity_bytes", None)
        if cap:
            phys = int(cap)
    except Exception:
        pass
    return int(phys * 0.8)


def _c_block_candidates(C, max_blk=128):
    """Channel-block candidates: multiples of 8 (ragged last block is fine), or the
    full channel extent when C < 8 (block dim == full array dim is also legal)."""
    cands = list(range(8, min(C, max_blk) + 1, 8))
    if not cands:
        cands = [C]
    return cands


def _pick_l_block(N, c_blk, HW, vmem_limit, per_elem_bytes, max_lanes=8192):
    """Largest lane tile (multiple of 128, capped) whose in-flight footprint fits."""
    budget_lanes = vmem_limit // max(N * c_blk * per_elem_bytes, 1)
    l_blk = (budget_lanes // 128) * 128
    l_blk = max(128, min(l_blk, max_lanes))
    return l_blk


# ---------------------------------------------------------------------------
# Kernels
# ---------------------------------------------------------------------------

def _bn_relu_onepass_kernel(x_ref, gamma_ref, beta_ref, o_ref, *, eps, inv_count):
    """x_ref: (N, c_blk, HW); gamma/beta: (c_blk, 1). Full per-channel reduction in
    VMEM; stats in f32; var = E[x^2] - mean^2 (clamped) to avoid a centered temp."""
    x = x_ref[...]
    xf = x.astype(jnp.float32)
    mean = jnp.sum(xf, axis=(0, 2), keepdims=True) * inv_count            # (1, c_blk, 1)
    ex2 = jnp.sum(xf * xf, axis=(0, 2), keepdims=True) * inv_count
    var = jnp.maximum(ex2 - mean * mean, 0.0)
    inv_std = jax.lax.rsqrt(var + eps)                                     # EUP
    a = gamma_ref[...][None, :, :] * inv_std                               # (1, c_blk, 1)
    b = beta_ref[...][None, :, :] - mean * a
    if x.dtype == jnp.float32:
        y = jnp.maximum(xf * a + b, 0.0)
    else:
        # Apply in the input dtype (bf16 VALU on v6e/v7x); Mosaic upcasts on v5e.
        y = jnp.maximum(x * a.astype(x.dtype) + b.astype(x.dtype), 0.0)
    o_ref[...] = y.astype(o_ref.dtype)


def _stats_kernel(x_ref, sum_ref, sumsq_ref, *, hw, l_blk, mask_lanes):
    """Accumulate per-channel sum / sum-of-squares across the trailing L grid axis.
    Ragged last lane tile is masked in-kernel (no wrapper-side pad)."""
    @pl.when(pl.program_id(1) == 0)
    def _():
        sum_ref[...] = jnp.zeros_like(sum_ref)
        sumsq_ref[...] = jnp.zeros_like(sumsq_ref)

    x = x_ref[...].astype(jnp.float32)                                     # (N, c_blk, l_blk)
    if mask_lanes:
        lane = jax.lax.broadcasted_iota(jnp.int32, x.shape, dimension=2)
        valid = (pl.program_id(1) * l_blk + lane) < hw
        x = jnp.where(valid, x, 0.0)
    sum_ref[...] += jnp.sum(x, axis=(0, 2))[:, None]
    sumsq_ref[...] += jnp.sum(x * x, axis=(0, 2))[:, None]


def _norm_relu_kernel(x_ref, a_ref, b_ref, o_ref):
    """y = max(x * a + b, 0); elementwise, so ragged boundary blocks need no mask
    (out-of-bounds lanes/channels are simply not written back)."""
    x = x_ref[...]
    a = a_ref[...][None, :, :]                                             # (1, c_blk, 1)
    b = b_ref[...][None, :, :]
    if x.dtype == jnp.float32:
        y = jnp.maximum(x * a + b, 0.0)
    else:
        y = jnp.maximum(x * a.astype(x.dtype) + b.astype(x.dtype), 0.0)
    o_ref[...] = y.astype(o_ref.dtype)


# ---------------------------------------------------------------------------
# Wrapper
# ---------------------------------------------------------------------------

def batch_norm_relu(x_nchw, gamma, beta, eps=1e-5, *, force_two_pass=False,
                    l_block_override=None):
    """Training-mode BatchNorm2d + ReLU forward.  x: (N, C, H, W); gamma, beta: (C,)."""
    N, C, H, W = x_nchw.shape
    HW = H * W
    count = N * HW
    out_dtype = x_nchw.dtype
    in_bytes = jnp.dtype(x_nchw.dtype).itemsize

    # Contiguous (N, C, HW) view -- free reshape, no HBM transpose.
    x3 = x_nchw.reshape(N, C, HW)
    g = jnp.asarray(gamma, jnp.float32).reshape(C, 1)
    b = jnp.asarray(beta, jnp.float32).reshape(C, 1)

    vmem_limit = _vmem_limit_bytes()
    cands = _c_block_candidates(C)

    # In-flight bytes per element of a block: 2x double-buffered input +
    # 2x double-buffered output + in-kernel f32 temps.
    per_elem_one = 2 * in_bytes + 2 * in_bytes + 8
    feasible = [c for c in cands if N * c * HW * per_elem_one <= vmem_limit]

    if feasible and not force_two_pass:
        # ---- One-pass path: 1x read + 1x write of x through HBM ----
        # Prefer >= 2 channel-grid steps (double buffering / v7x dual-TC), then the
        # largest block that fits.
        multi = [c for c in feasible if pl.cdiv(C, c) >= 2]
        c_blk = max(multi) if multi else max(feasible)
        n_c = pl.cdiv(C, c_blk)

        kernel = functools.partial(_bn_relu_onepass_kernel,
                                   eps=float(eps), inv_count=1.0 / float(count))
        out3 = pl.pallas_call(
            kernel,
            out_shape=jax.ShapeDtypeStruct((N, C, HW), out_dtype),
            grid=(n_c,),
            in_specs=[
                pl.BlockSpec((N, c_blk, HW), lambda i: (0, i, 0)),
                pl.BlockSpec((c_blk, 1), lambda i: (i, 0)),
                pl.BlockSpec((c_blk, 1), lambda i: (i, 0)),
            ],
            out_specs=pl.BlockSpec((N, c_blk, HW), lambda i: (0, i, 0)),
            compiler_params=pltpu.CompilerParams(
                dimension_semantics=("parallel",),
                vmem_limit_bytes=vmem_limit,
            ),
        )(x3, g, b)
        return out3.reshape(N, C, H, W)

    # ---- Two-pass path (activations too large for any channel block) ----
    # Small channel block + large lane tile: long contiguous DMA runs and a
    # lane-dense out_spec; no wrapper-side pad/slice of the activation tensor.
    c_blk = cands[0]
    per_elem_two = 2 * in_bytes + 2 * in_bytes + 4
    l_blk = l_block_override or _pick_l_block(N, c_blk, HW, vmem_limit, per_elem_two)
    if l_blk > HW:
        l_blk = HW                       # full-extent lane block is always legal
    n_c = pl.cdiv(C, c_blk)
    n_l = pl.cdiv(HW, l_blk)
    mask_lanes = (HW % l_blk) != 0       # only the last lane tile is ragged

    stats_kernel = functools.partial(_stats_kernel, hw=HW, l_blk=l_blk,
                                     mask_lanes=mask_lanes)
    sums, sumsqs = pl.pallas_call(
        stats_kernel,
        out_shape=(jax.ShapeDtypeStruct((C, 1), jnp.float32),
                   jax.ShapeDtypeStruct((C, 1), jnp.float32)),
        grid=(n_c, n_l),
        in_specs=[pl.BlockSpec((N, c_blk, l_blk), lambda i, j: (0, i, j))],
        out_specs=(pl.BlockSpec((c_blk, 1), lambda i, j: (i, 0)),
                   pl.BlockSpec((c_blk, 1), lambda i, j: (i, 0))),
        compiler_params=pltpu.CompilerParams(
            dimension_semantics=("parallel", "arbitrary"),
            vmem_limit_bytes=vmem_limit,
        ),
    )(x3)

    # Tiny per-channel math (C elements): fused scale / shift coefficients.
    inv_count = 1.0 / float(count)
    mean = sums * inv_count
    var = jnp.maximum(sumsqs * inv_count - mean * mean, 0.0)   # clamp E[x^2]-mean^2
    inv_std = jax.lax.rsqrt(var + eps)
    a = g * inv_std                      # (C, 1)
    bias = b - mean * a                  # (C, 1)

    out3 = pl.pallas_call(
        _norm_relu_kernel,
        out_shape=jax.ShapeDtypeStruct((N, C, HW), out_dtype),
        grid=(n_c, n_l),
        in_specs=[
            pl.BlockSpec((N, c_blk, l_blk), lambda i, j: (0, i, j)),
            pl.BlockSpec((c_blk, 1), lambda i, j: (i, 0)),
            pl.BlockSpec((c_blk, 1), lambda i, j: (i, 0)),
        ],
        out_specs=pl.BlockSpec((N, c_blk, l_blk), lambda i, j: (0, i, j)),
        compiler_params=pltpu.CompilerParams(
            dimension_semantics=("parallel", "parallel"),
            vmem_limit_bytes=vmem_limit,
        ),
    )(x3, a, bias)

    return out3.reshape(N, C, H, W)


# ---------------------------------------------------------------------------
# Self-test
# ---------------------------------------------------------------------------

if __name__ == "__main__":
    def ref_fn(x, gamma, beta, eps=1e-5):
        mean = jnp.mean(x, axis=(0, 2, 3), keepdims=True)
        var = jnp.mean((x - mean) ** 2, axis=(0, 2, 3), keepdims=True)
        y = (x - mean) * jax.lax.rsqrt(var + eps)
        y = y * gamma.reshape(1, -1, 1, 1) + beta.reshape(1, -1, 1, 1)
        return jnp.maximum(y, 0.0)

    key = jax.random.PRNGKey(0)
    N, C, H, W = 2, 4, 16, 16
    x = jax.random.normal(key, (N, C, H, W), dtype=jnp.float32)

    # nn.BatchNorm2d default affine init: weight=1, bias=0 (momentum only affects
    # running stats, which are not part of this forward's output).
    gamma = jnp.ones((C,), dtype=jnp.float32)
    beta = jnp.zeros((C,), dtype=jnp.float32)
    ref = ref_fn(x, gamma, beta)

    # One-pass (fused stats + normalize) path.
    out1 = jax.block_until_ready(batch_norm_relu(x, gamma, beta, eps=1e-5))
    assert out1.shape == x.shape
    assert jnp.allclose(out1, ref, atol=1e-4, rtol=1e-4), "one-pass mismatch vs reference"

    # Two-pass path forced at this small shape (l_blk=128 -> 2 lane tiles).
    out2 = jax.block_until_ready(
        batch_norm_relu(x, gamma, beta, eps=1e-5,
                        force_two_pass=True, l_block_override=128))
    assert jnp.allclose(out2, ref, atol=1e-4, rtol=1e-4), "two-pass mismatch vs reference"

    # Ragged-boundary coverage: C=12 (channel grid 2 blocks, last partial) and
    # HW=384 with l_blk=256 (last lane tile half-valid -> in-kernel mask, no pad).
    x3 = jax.random.normal(jax.random.PRNGKey(1), (2, 12, 16, 24), dtype=jnp.float32)
    g3 = jnp.linspace(0.5, 1.5, 12).astype(jnp.float32)
    b3 = jnp.linspace(-0.2, 0.2, 12).astype(jnp.float32)
    ref3 = ref_fn(x3, g3, b3)

    out3a = jax.block_until_ready(batch_norm_relu(x3, g3, b3, eps=1e-5))
    assert jnp.allclose(out3a, ref3, atol=1e-4, rtol=1e-4), "ragged one-pass mismatch"

    out3b = jax.block_until_ready(
        batch_norm_relu(x3, g3, b3, eps=1e-5,
                        force_two_pass=True, l_block_override=256))
    assert jnp.allclose(out3b, ref3, atol=1e-4, rtol=1e-4), "ragged two-pass mismatch"

    print("KERNEL_OK")
</pallas_src>

<mosaic_0001>
module attributes {stable_mosaic.version = 11 : i64} {
  func.func @_bn_relu_onepass_kernel(%arg0: i32, %arg1: memref<2x4x256xf32, #tpu.memory_space<vmem>>, %arg2: memref<4x1xf32, #tpu.memory_space<vmem>>, %arg3: memref<4x1xf32, #tpu.memory_space<vmem>>, %arg4: memref<2x4x256xf32, #tpu.memory_space<vmem>>) attributes {dimension_semantics = [#tpu.dimension_semantics<parallel>], iteration_bounds = array<i64: 1>, scalar_prefetch = 0 : i64, scratch_operands = 0 : i64, tpu.core_type = #tpu.core_type<tc>, window_params = [{transform_indices = @transform_0, window_bounds = array<i64: 2, 4, 256>}, {transform_indices = @transform_1, window_bounds = array<i64: 4, 1>}, {transform_indices = @transform_2, window_bounds = array<i64: 4, 1>}, {transform_indices = @transform_3, window_bounds = array<i64: 2, 4, 256>}]} {
    %c0 = arith.constant 0 : index
    %c0_0 = arith.constant 0 : index
    %c0_1 = arith.constant 0 : index
    %0 = vector.load %arg1[%c0, %c0_0, %c0_1] : memref<2x4x256xf32, #tpu.memory_space<vmem>>, vector<2x4x256xf32>
    %cst = arith.constant dense<0.000000e+00> : vector<4xf32>
    %1 = vector.multi_reduction <add>, %0, %cst [0, 2] : vector<2x4x256xf32> to vector<4xf32>
    %2 = vector.shape_cast %1 : vector<4xf32> to vector<1x4x1xf32>
    %cst_2 = arith.constant 0.001953125 : f32
    %3 = vector.broadcast %cst_2 : f32 to vector<1x4x1xf32>
    %4 = arith.mulf %2, %3 : vector<1x4x1xf32>
    %5 = arith.mulf %0, %0 : vector<2x4x256xf32>
    %cst_3 = arith.constant dense<0.000000e+00> : vector<4xf32>
    %6 = vector.multi_reduction <add>, %5, %cst_3 [0, 2] : vector<2x4x256xf32> to vector<4xf32>
    %7 = vector.shape_cast %6 : vector<4xf32> to vector<1x4x1xf32>
    %cst_4 = arith.constant 0.001953125 : f32
    %8 = vector.broadcast %cst_4 : f32 to vector<1x4x1xf32>
    %9 = arith.mulf %7, %8 : vector<1x4x1xf32>
    %10 = arith.mulf %4, %4 : vector<1x4x1xf32>
    %11 = arith.subf %9, %10 : vector<1x4x1xf32>
    %cst_5 = arith.constant 0.000000e+00 : f32
    %12 = vector.broadcast %cst_5 : f32 to vector<1x4x1xf32>
    %13 = arith.maximumf %11, %12 : vector<1x4x1xf32>
    %cst_6 = arith.constant 9.99999974E-6 : f32
    %14 = vector.broadcast %cst_6 : f32 to vector<1x4x1xf32>
    %15 = arith.addf %13, %14 : vector<1x4x1xf32>
    %16 = math.rsqrt %15 : vector<1x4x1xf32>
    %c0_7 = arith.constant 0 : index
    %c0_8 = arith.constant 0 : index
    %17 = vector.load %arg2[%c0_7, %c0_8] : memref<4x1xf32, #tpu.memory_space<vmem>>, vector<4x1xf32>
    %18 = vector.shape_cast %17 : vector<4x1xf32> to vector<1x4x1xf32>
    %19 = arith.mulf %18, %16 : vector<1x4x1xf32>
    %c0_9 = arith.constant 0 : index
    %c0_10 = arith.constant 0 : index
    %20 = vector.load %arg3[%c0_9, %c0_10] : memref<4x1xf32, #tpu.memory_space<vmem>>, vector<4x1xf32>
    %21 = vector.shape_cast %20 : vector<4x1xf32> to vector<1x4x1xf32>
    %22 = arith.mulf %4, %19 : vector<1x4x1xf32>
    %23 = arith.subf %21, %22 : vector<1x4x1xf32>
    %24 = vector.broadcast %19 : vector<1x4x1xf32> to vector<2x4x256xf32>
    %25 = arith.mulf %0, %24 : vector<2x4x256xf32>
    %26 = vector.broadcast %23 : vector<1x4x1xf32> to vector<2x4x256xf32>
    %27 = arith.addf %25, %26 : vector<2x4x256xf32>
    %cst_11 = arith.constant 0.000000e+00 : f32
    %28 = vector.broadcast %cst_11 : f32 to vector<2x4x256xf32>
    %29 = arith.maximumf %27, %28 : vector<2x4x256xf32>
    %c0_12 = arith.constant 0 : index
    %c0_13 = arith.constant 0 : index
    %c0_14 = arith.constant 0 : index
    %30 = vector.load %arg4[%c0_12, %c0_13, %c0_14] : memref<2x4x256xf32, #tpu.memory_space<vmem>>, vector<2x4x256xf32>
    tpu.vector_store %arg4[%c0_12, %c0_13, %c0_14], %29 {strides = array<i32>} : memref<2x4x256xf32, #tpu.memory_space<vmem>>, vector<2x4x256xf32>,
    return
  }
  func.func @transform_0(%arg0: i32) -> (i32, i32, i32) {
    %c0_i32 = arith.constant 0 : i32
    %c0_i32_0 = arith.constant 0 : i32
    %c0_i32_1 = arith.constant 0 : i32
    return %c0_i32, %arg0, %c0_i32_0 : i32, i32, i32
  }
  func.func @transform_1(%arg0: i32) -> (i32, i32) {
    %c0_i32 = arith.constant 0 : i32
    %c0_i32_0 = arith.constant 0 : i32
    return %arg0, %c0_i32 : i32, i32
  }
  func.func @transform_2(%arg0: i32) -> (i32, i32) {
    %c0_i32 = arith.constant 0 : i32
    %c0_i32_0 = arith.constant 0 : i32
    return %arg0, %c0_i32 : i32, i32
  }
  func.func @transform_3(%arg0: i32) -> (i32, i32, i32) {
    %c0_i32 = arith.constant 0 : i32
    %c0_i32_0 = arith.constant 0 : i32
    %c0_i32_1 = arith.constant 0 : i32
    return %c0_i32, %arg0, %c0_i32_0 : i32, i32, i32
  }
}

</mosaic_0001>

<bundles_post_ra>
// kernel: tpu_custom_call.1
= control target key start
LH: loop header
LB: loop body
LE: loop exit
PB: predicated region body
PF: predicated region fallthrough
CT: control target
= control target key end

     0   :  { %8 = vsyncpa [#allocation3], 0  ;;  %s255_s0 = inlined_call_operand.hbm [shape: f32[2,4,256], index: 0, kind: input, shape index: {}]   ;;  %s256_s1 = inlined_call_operand.vmem [shape: f32[4,1], index: 1, kind: input, shape index: {}]   ;;  %s257_s2 = inlined_call_operand.vmem [shape: f32[4,1], index: 2, kind: input, shape index: {}]   ;;  %s258_s3 = inlined_call_operand.hbm [shape: f32[2,4,256], index: 3, kind: output, shape index: {}]  }
   0x1   :  { %9 = vsyncpa [#allocation4], 0  ;;  %s185_s12 = smov [#allocation2]   ;;  %s137_s16 = scalar_lea.hbm %s255_s0, 256 }
   0x2   :  { %s15_s13 = sshll.u32 %s185_s12, 4  ;;  %p138_p0 = scmp.ne.s32.totalorder %s255_s0, %s137_s16  ;;  %s16_s13 = int_to_ptr.vmem [resolvable:$true] %s15_s13 }
   0x3   :  { %p141_p1 = scmp.lt.u32.totalorder %s137_s16, %s255_s0 }
   0x5   :  { %p143_p2 = pnand %p141_p1, %p138_p0 }
   0x7   :  { %146 = shalt.err (!%p143_p2)
}
   0x8   :  { %s147_s21 = scalar_lea.vmem %s16_s13, 256  ;;  %p152_p4 = scmp.lt.s32.totalorder %s16_s13, %s16_s13 }
   0x9   :  { %p148_p3 = scmp.ne.s32.totalorder %s16_s13, %s147_s21  ;;  %p153_p5 = scmp.lt.s32.totalorder %s147_s21, %s147_s21 }
   0xb   :  { %p154_p6 = por %p153_p5, %p152_p4 }
   0xd   :  { %p155_p7 = pnand %p154_p6, %p148_p3 }
   0xf   :  { %158 = shalt.err (!%p155_p7)
}
  0x10   :  { %s186_s22 = smov 128   ;;  %s187_s23 = smov 8  }
  0x11   :  { %21 = dma.hbm_to_vmem [thread:$0]  %s255_s0, 256, %s16_s13, [#allocation3], %s186_s22, %s186_s22, %s187_s23  }
  0x12   :  { %181 = dma.done.wait [#allocation3], 256  }
  0x13   :  { %182 = vsyncadd [#allocation3], 4294967040  ;;  %vm37_vm0 = vcmask 1043456   ;;  %v29_v0 = vld [vmem:[#allocation2] sm:$0xff]  ;;  %v30_v1 = vld [vmem:[#allocation2 + $0x8] sm:$0xff]  ;;  %v188_v22 = vmov 0   ;;  %v83_v39 = vlaneseq }
  0x14   :  { %v33_v2 = vcombine.high %v29_v0, %v29_v0  ;;  %v34_v3 = vcombine.high %v30_v1, %v30_v1  ;;  %v38_v4 = vsel %vm37_vm0, %v29_v0, 0.0  ;;  %v48_v5 = vmul.f32 %v29_v0, %v29_v0  ;;  %131 = vset.pattern.permute.xlu1 %v188_v22  ;;  %132 = vset.pattern.permute.xlu0 %v188_v22  ;;  %v71_v31 = vld [vmem:[%s256_s1] sm:$0xf]  ;;  %s190_s1 = smov [#allocation5]  }
  0x15   :  { %v49_v6 = vmul.f32 %v30_v1, %v30_v1  ;;  %v41_v8 = vsel %vm37_vm0, %v30_v1, 0.0  ;;  %v73_v34 = vld [vmem:[%s257_s2] sm:$0xf]  ;;  %v189_v37 = vmov 839922192   ;;  %v84_v41 = vshrl.u32 %v83_v39, 7 }
  0x16   :  { %v39_v7 = vsel %vm37_vm0, %v33_v2, 0.0  ;;  %v52_v10 = vcombine.high %v48_v5, %v48_v5  ;;  %v56_v12 = vsel %vm37_vm0, %v48_v5, 0.0  ;;  %v43_v13 = vsel %vm37_vm0, %v34_v3, 0.0  ;;  %s113_s29 = sshll.u32 %s190_s1, 4  ;;  %s114_s29 = int_to_ptr.vmem [resolvable:$true] %s113_s29 }
  0x17   :  { %v40_v9 = vadd.f32 %v39_v7, %v38_v4  ;;  %v53_v11 = vcombine.high %v49_v6, %v49_v6  ;;  %v59_v16 = vsel %vm37_vm0, %v49_v6, 0.0  ;;  %v81_v38 = vunpack.c.l.s4 %v189_v37  ;;  %s159_s2 = scalar_lea.vmem %s114_s29, 256  ;;  %p164_p9 = scmp.lt.s32.totalorder %s114_s29, %s114_s29 }
  0x18   :  { %v57_v15 = vsel %vm37_vm0, %v52_v10, 0.0  ;;  %p160_p8 = scmp.ne.s32.totalorder %s114_s29, %s159_s2  ;;  %p165_p10 = scmp.lt.s32.totalorder %s159_s2, %s159_s2 }
  0x19   :  { %v42_v14 = vadd.f32 %v41_v8, %v40_v9  ;;  %v58_v17 = vadd.f32 %v57_v15, %v56_v12  ;;  %v61_v19 = vsel %vm37_vm0, %v53_v11, 0.0  ;;  %v82_v40 = vunpack.c.0.s8 %v81_v38 }
  0x1a   :  { %p166_p11 = por %p165_p10, %p164_p9 }
  0x1b   :  { %v44_v18 = vadd.f32 %v43_v13, %v42_v14  ;;  %v60_v20 = vadd.f32 %v59_v16, %v58_v17  ;;  %v85_v42 = vsub.s32 %v82_v40, %v84_v41 }
  0x1c   :  { %p167_p12 = pnand %p166_p11, %p160_p8 }
  0x1d   :  { %45 = vadd.xlane.f32.xlu0 %v44_v18  ;;  %v62_v21 = vadd.f32 %v61_v19, %v60_v20 }
  0x21   :  { %63 = vadd.xlane.f32.xlu0 %v62_v21 }
  0xaa   :  { %v46_v23 = vpop.xlane.xlu0 %45 }
  0xab   :  { %v47_v24 = vmul.f32 0.001953125, %v46_v23 }
  0xad   :  { %v66_v26 = vmul.f32 %v47_v24, %v47_v24 }
  0xae   :  { %v64_v25 = vpop.xlane.xlu0 %63 }
  0xaf   :  { %v65_v27 = vmul.f32 0.001953125, %v64_v25 }
  0xb1   :  { %v67_v28 = vsub.f32 %v65_v27, %v66_v26 }
  0xb3   :  { %v68_v29 = vmax.f32 %v67_v28, 0.0 }
  0xb5   :  { %v69_v30 = vadd.f32 1e-05, %v68_v29 }
  0xb7   :  { %135 = vrsqrt.f32 %v69_v30 }
  0xc1   :  { %v136_v32 = vpop.eup %135 }
  0xc2   :  { %v72_v33 = vmul.f32 %v136_v32, %v71_v31 }
  0xc4   :  { %78 = vperm.xlu1 %131, %v72_v33   ;;  %v74_v35 = vmul.f32 %v72_v33, %v47_v24 }
  0xc6   :  { %v75_v36 = vsub.f32 %v73_v34, %v74_v35 }
  0xc8   :  { %92 = vperm.xlu1 %131, %v75_v36  }
 0x143   :  { %v79_v43 = vpop.permute.xlu1 %78 }
 0x144   :  { %v86_v44 = vrot.slane %v79_v43, %v85_v42 }
 0x146   :  { %v88_v46 = vmul.f32 %v86_v44, %v29_v0  ;;  %v89_v47 = vmul.f32 %v86_v44, %v30_v1 }
 0x147   :  { %v93_v45 = vpop.permute.xlu1 %92 }
 0x148   :  { %v100_v48 = vrot.slane %v93_v45, %v85_v42 }
 0x14a   :  { %v102_v49 = vadd.f32 %v100_v48, %v88_v46  ;;  %v103_v50 = vadd.f32 %v100_v48, %v89_v47 }
 0x14c   :  { %v104_v51 = vmax.f32 %v102_v49, 0.0  ;;  %v105_v52 = vmax.f32 %v103_v50, 0.0 }
 0x14e   :  { %106 = vst [vmem:[#allocation5] sm:$0xff] %v104_v51  ;;  %107 = vst [vmem:[#allocation5 + $0x8] sm:$0xff] %v105_v52 }
 0x14f   :  { %170 = shalt.err (!%p167_p12)
}
 0x150   :  { %s171_s5 = scalar_lea.hbm %s258_s3, 256 }
 0x151   :  { %p172_p13 = scmp.ne.s32.totalorder %s258_s3, %s171_s5  ;;  %p175_p0 = scmp.lt.u32.totalorder %s171_s5, %s258_s3 }
 0x153   :  { %p177_p1 = pnand %p175_p0, %p172_p13 }
 0x155   :  { %180 = shalt.err (!%p177_p1)
}
 0x156   :  { %119 = dma.vmem_to_hbm [thread:$0]  %s114_s29, 256, %s258_s3, [#allocation4], %s186_s22, %s186_s22, %s187_s23  }
 0x157   :  { %183 = dma.done.wait [#allocation4], 256  }
 0x158   :  { %184 = vsyncadd [#allocation4], 4294967040 }
 0x159   :  { %123 = vsyncpa [#allocation3], 1 }
 0x15a   :  { %124 = vsyncpa [#allocation4], 1 }

</bundles_post_ra>
